<compile_context>
chip_gen: v7x
topology: tpu7x:2x2x1
jax: 0.10.0
libtpu: 0.0.40
codegen_flags: <defaults>
</compile_context>

<pallas_src>
import functools

import jax
import jax.numpy as jnp
from jax.experimental import pallas as pl
from jax.experimental.pallas import tpu as pltpu


def _layernorm_kernel(alpha_ref, bias_ref, x_ref, o_ref, *, eps, d):
    # alpha_ref / bias_ref: (1,) f32 scalars in SMEM (read once per tile)
    # x_ref / o_ref: (tile_rows, D) tiles in VMEM; D maps to lanes.
    x = x_ref[...].astype(jnp.float32)
    alpha = alpha_ref[0]
    bias = bias_ref[0]

    mean = jnp.mean(x, axis=-1, keepdims=True)
    diff = x - mean
    # torch.std default: unbiased (divide by D-1). Two-pass form kept to match
    # the reference numerics exactly (kernel is HBM-bound, not XLU-bound).
    var = jnp.sum(diff * diff, axis=-1, keepdims=True) * (1.0 / float(d - 1))
    std = jnp.sqrt(var)

    denom = std + eps                       # denom > 0 always
    inv = pl.reciprocal(denom, approx=True)  # EUP slot (free vs VALU)
    inv = inv * (2.0 - denom * inv)          # one Newton step -> f32 accuracy

    o_ref[...] = (alpha * diff * inv + bias).astype(o_ref.dtype)


def _round_up(n, m):
    return ((n + m - 1) // m) * m


def encoder_forward(x, alpha, bias, *, eps=1e-6, rows_per_tile=512):
    """Encoder with an empty layer stack: forward == LayerNormalization(x)."""
    B, S, D = x.shape
    rows = B * S
    x2d = x.reshape(rows, D)

    itemsize = jnp.dtype(x.dtype).itemsize
    # Sublane alignment for the second-to-last block dim: 8 (f32) / 16 (bf16).
    row_align = 8 * (4 // itemsize)

    # Cap the tile so (input + output) double buffers fit a ~24 MiB budget
    # (headroom under v7x's 32 MiB scoped / 64 MiB physical VMEM).
    vmem_budget = 24 * 1024 * 1024
    max_rows = max(row_align,
                   (vmem_budget // (4 * D * itemsize)) // row_align * row_align)
    tile_rows = min(rows_per_tile, max_rows)
    tile_rows = max(row_align, (tile_rows // row_align) * row_align)
    # No point in a tile larger than the (row-aligned) input itself.
    tile_rows = min(tile_rows, _round_up(rows, row_align))

    # Ragged tail: pad rows up to a tile multiple; padded rows are sliced off.
    padded_rows = _round_up(rows, tile_rows)
    if padded_rows != rows:
        x2d = jnp.pad(x2d, ((0, padded_rows - rows), (0, 0)))

    kernel = functools.partial(_layernorm_kernel, eps=float(eps), d=D)

    out2d = pl.pallas_call(
        kernel,
        out_shape=jax.ShapeDtypeStruct((padded_rows, D), x.dtype),
        grid_spec=pltpu.PrefetchScalarGridSpec(
            num_scalar_prefetch=0,
            grid=(padded_rows // tile_rows,),
            in_specs=[
                pl.BlockSpec(memory_space=pltpu.MemorySpace.SMEM),  # alpha
                pl.BlockSpec(memory_space=pltpu.MemorySpace.SMEM),  # bias
                # D stays untiled (last dim == full array dim); in production
                # shapes D should be a multiple of 128 for lane-dense stores.
                pl.BlockSpec((tile_rows, D), lambda i: (i, 0)),
            ],
            out_specs=pl.BlockSpec((tile_rows, D), lambda i: (i, 0)),
        ),
        compiler_params=pltpu.CompilerParams(
            dimension_semantics=("parallel",),
            vmem_limit_bytes=32 * 1024 * 1024,
        ),
    )(alpha, bias, x2d)

    if padded_rows != rows:
        out2d = out2d[:rows]
    return out2d.reshape(B, S, D)


def encoder_reference(x, alpha, bias, eps=1e-6):
    mean = jnp.mean(x, axis=-1, keepdims=True)
    var = jnp.var(x, axis=-1, keepdims=True, ddof=1)  # unbiased, like torch.std
    std = jnp.sqrt(var)
    return alpha[0] * (x - mean) / (std + eps) + bias[0]


if __name__ == "__main__":
    key = jax.random.PRNGKey(0)
    B, S, D = 2, 8, 32  # batch, seq, hidden  (D > 1 required: unbiased std)
    x = jax.random.normal(key, (B, S, D), dtype=jnp.float32)

    # Deterministic parameter init matching the module: alpha=1, bias=0
    alpha = jnp.ones((1,), dtype=jnp.float32)
    bias = jnp.zeros((1,), dtype=jnp.float32)

    out = encoder_forward(x, alpha, bias)
    out = jax.block_until_ready(out)

    ref = encoder_reference(x, alpha, bias)
    assert out.shape == (B, S, D)
    assert jnp.allclose(out, ref, atol=1e-5, rtol=1e-5), "mismatch vs reference"

    print("KERNEL_OK")
</pallas_src>

<mosaic_0001>
module attributes {stable_mosaic.version = 11 : i64} {
  func.func @_layernorm_kernel(%arg0: i32, %arg1: memref<1xf32, #tpu.memory_space<smem>>, %arg2: memref<1xf32, #tpu.memory_space<smem>>, %arg3: memref<16x32xf32, #tpu.memory_space<vmem>>, %arg4: memref<16x32xf32, #tpu.memory_space<vmem>>) attributes {dimension_semantics = [#tpu.dimension_semantics<parallel>], iteration_bounds = array<i64: 1>, scalar_prefetch = 0 : i64, scratch_operands = 0 : i64, tpu.core_type = #tpu.core_type<tc>, window_params = [{transform_indices = @transform_0, window_bounds = array<i64: 1>}, {transform_indices = @transform_1, window_bounds = array<i64: 1>}, {transform_indices = @transform_2, window_bounds = array<i64: 16, 32>}, {transform_indices = @transform_3, window_bounds = array<i64: 16, 32>}]} {
    %c0 = arith.constant 0 : index
    %c0_0 = arith.constant 0 : index
    %0 = vector.load %arg3[%c0, %c0_0] : memref<16x32xf32, #tpu.memory_space<vmem>>, vector<16x32xf32>
    %c0_1 = arith.constant 0 : index
    %1 = memref.load %arg1[%c0_1] : memref<1xf32, #tpu.memory_space<smem>>
    %c0_2 = arith.constant 0 : index
    %2 = memref.load %arg2[%c0_2] : memref<1xf32, #tpu.memory_space<smem>>
    %cst = arith.constant dense<0.000000e+00> : vector<16xf32>
    %3 = vector.multi_reduction <add>, %0, %cst [1] : vector<16x32xf32> to vector<16xf32>
    %4 = vector.shape_cast %3 : vector<16xf32> to vector<16x1xf32>
    %cst_3 = arith.constant 3.200000e+01 : f32
    %5 = vector.broadcast %cst_3 : f32 to vector<16x1xf32>
    %6 = arith.divf %4, %5 : vector<16x1xf32>
    %7 = vector.broadcast %6 : vector<16x1xf32> to vector<16x32xf32>
    %8 = arith.subf %0, %7 : vector<16x32xf32>
    %9 = arith.mulf %8, %8 : vector<16x32xf32>
    %cst_4 = arith.constant dense<0.000000e+00> : vector<16xf32>
    %10 = vector.multi_reduction <add>, %9, %cst_4 [1] : vector<16x32xf32> to vector<16xf32>
    %11 = vector.shape_cast %10 : vector<16xf32> to vector<16x1xf32>
    %cst_5 = arith.constant 0.0322580636 : f32
    %12 = vector.broadcast %cst_5 : f32 to vector<16x1xf32>
    %13 = arith.mulf %11, %12 : vector<16x1xf32>
    %14 = math.sqrt %13 : vector<16x1xf32>
    %cst_6 = arith.constant 9.99999997E-7 : f32
    %15 = vector.broadcast %cst_6 : f32 to vector<16x1xf32>
    %16 = arith.addf %14, %15 : vector<16x1xf32>
    %17 = tpu.reciprocal %16 {approx = true} : vector<16x1xf32> -> vector<16x1xf32>
    %18 = arith.mulf %16, %17 : vector<16x1xf32>
    %cst_7 = arith.constant 2.000000e+00 : f32
    %19 = vector.broadcast %cst_7 : f32 to vector<16x1xf32>
    %20 = arith.subf %19, %18 : vector<16x1xf32>
    %21 = arith.mulf %17, %20 : vector<16x1xf32>
    %22 = vector.broadcast %1 : f32 to vector<16x32xf32>
    %23 = arith.mulf %22, %8 : vector<16x32xf32>
    %24 = vector.broadcast %21 : vector<16x1xf32> to vector<16x32xf32>
    %25 = arith.mulf %23, %24 : vector<16x32xf32>
    %26 = vector.broadcast %2 : f32 to vector<16x32xf32>
    %27 = arith.addf %25, %26 : vector<16x32xf32>
    %c0_8 = arith.constant 0 : index
    %c0_9 = arith.constant 0 : index
    %28 = vector.load %arg4[%c0_8, %c0_9] : memref<16x32xf32, #tpu.memory_space<vmem>>, vector<16x32xf32>
    tpu.vector_store %arg4[%c0_8, %c0_9], %27 {strides = array<i32>} : memref<16x32xf32, #tpu.memory_space<vmem>>, vector<16x32xf32>,
    return
  }
  func.func @transform_0(%arg0: i32) -> i32 {
    %c0_i32 = arith.constant 0 : i32
    %c0_i32_0 = arith.constant 0 : i32
    return %c0_i32 : i32
  }
  func.func @transform_1(%arg0: i32) -> i32 {
    %c0_i32 = arith.constant 0 : i32
    %c0_i32_0 = arith.constant 0 : i32
    return %c0_i32 : i32
  }
  func.func @transform_2(%arg0: i32) -> (i32, i32) {
    %c0_i32 = arith.constant 0 : i32
    %c0_i32_0 = arith.constant 0 : i32
    return %arg0, %c0_i32 : i32, i32
  }
  func.func @transform_3(%arg0: i32) -> (i32, i32) {
    %c0_i32 = arith.constant 0 : i32
    %c0_i32_0 = arith.constant 0 : i32
    return %arg0, %c0_i32 : i32, i32
  }
}

</mosaic_0001>

<bundles_post_ra>
// kernel: tpu_custom_call.1
= control target key start
LH: loop header
LB: loop body
LE: loop exit
PB: predicated region body
PF: predicated region fallthrough
CT: control target
= control target key end

     0   :  { %10 = vsyncpa [#allocation5], 0  ;;  %s234_s0 = inlined_call_operand.<no memory space> [shape: f32[1], index: 0, kind: input, shape index: {}]   ;;  %s235_s1 = inlined_call_operand.<no memory space> [shape: f32[1], index: 1, kind: input, shape index: {}]   ;;  %s236_s2 = inlined_call_operand.hbm [shape: f32[16,32], index: 2, kind: input, shape index: {}]   ;;  %s237_s3 = inlined_call_operand.hbm [shape: f32[16,32], index: 3, kind: output, shape index: {}]  }
   0x1   :  { %11 = vsyncpa [#allocation6], 0  ;;  %s168_s12 = smov [#allocation4]   ;;  %s120_s16 = scalar_lea.hbm %s236_s2, 256 }
   0x2   :  { %s21_s13 = sshll.u32 %s168_s12, 4  ;;  %p121_p0 = scmp.ne.s32.totalorder %s236_s2, %s120_s16  ;;  %s22_s13 = int_to_ptr.vmem [resolvable:$true] %s21_s13 }
   0x3   :  { %p124_p1 = scmp.lt.u32.totalorder %s120_s16, %s236_s2 }
   0x5   :  { %p126_p2 = pnand %p124_p1, %p121_p0 }
   0x7   :  { %129 = shalt.err (!%p126_p2)
}
   0x8   :  { %s130_s21 = scalar_lea.vmem %s22_s13, 256  ;;  %p135_p4 = scmp.lt.s32.totalorder %s22_s13, %s22_s13 }
   0x9   :  { %p131_p3 = scmp.ne.s32.totalorder %s22_s13, %s130_s21  ;;  %p136_p5 = scmp.lt.s32.totalorder %s130_s21, %s130_s21 }
   0xb   :  { %p137_p6 = por %p136_p5, %p135_p4 }
   0xd   :  { %p138_p7 = pnand %p137_p6, %p131_p3 }
   0xf   :  { %141 = shalt.err (!%p138_p7)
}
  0x10   :  { %s169_s22 = smov 128   ;;  %s170_s23 = smov 8  }
  0x11   :  { %27 = dma.hbm_to_vmem [thread:$0]  %s236_s2, 256, %s22_s13, [#allocation5], %s169_s22, %s169_s22, %s170_s23  }
  0x12   :  { %164 = dma.done.wait [#allocation5], 256  }
  0x13   :  { %165 = vsyncadd [#allocation5], 4294967040  ;;  %vm35_vm0 = vcmask 261120   ;;  %v31_v0 = vld [vmem:[#allocation4] sm:$0xff]  ;;  %v32_v1 = vld [vmem:[#allocation4 + $0x8] sm:$0xff]  ;;  %v81_v32 = vstv %s234_s0  ;;  %v86_v38 = vstv %s235_s1  ;;  %s171_s29 = smov [#allocation7]  }
  0x14   :  { %v36_v2 = vsel %vm35_vm0, %v31_v0, 0.0  ;;  %v39_v3 = vsel %vm35_vm0, %v32_v1, 0.0  ;;  %s96_s30 = sshll.u32 %s171_s29, 4  ;;  %s97_s30 = int_to_ptr.vmem [resolvable:$true] %s96_s30 }
  0x15   :  { %37 = vadd.xlane.f32.xlu0 %v36_v2  ;;  %s142_s0 = scalar_lea.vmem %s97_s30, 256  ;;  %p147_p9 = scmp.lt.s32.totalorder %s97_s30, %s97_s30 }
  0x16   :  { %p143_p8 = scmp.ne.s32.totalorder %s97_s30, %s142_s0  ;;  %p148_p10 = scmp.lt.s32.totalorder %s142_s0, %s142_s0 }
  0x18   :  { %p149_p11 = por %p148_p10, %p147_p9 }
  0x19   :  { %40 = vadd.xlane.f32.xlu0 %v39_v3 }
  0x1a   :  { %p150_p12 = pnand %p149_p11, %p143_p8 }
  0xa2   :  { %v38_v4 = vpop.xlane.xlu0 %37 }
  0xa3   :  { %v43_v5 = vmul.f32 0.03125, %v38_v4 }
  0xa5   :  { %v45_v6 = vsub.f32 %v31_v0, %v43_v5 }
  0xa6   :  { %v41_v7 = vpop.xlane.xlu0 %40 }
  0xa7   :  { %v44_v8 = vmul.f32 0.03125, %v41_v7  ;;  %v47_v9 = vmul.f32 %v45_v6, %v45_v6  ;;  %v82_v35 = vmul.f32 %v81_v32, %v45_v6 }
  0xa9   :  { %v46_v10 = vsub.f32 %v32_v1, %v44_v8  ;;  %v49_v11 = vsel %vm35_vm0, %v47_v9, 0.0 }
  0xaa   :  { %50 = vadd.xlane.f32.xlu1 %v49_v11 }
  0xab   :  { %v48_v12 = vmul.f32 %v46_v10, %v46_v10  ;;  %v83_v41 = vmul.f32 %v81_v32, %v46_v10 }
  0xad   :  { %v52_v13 = vsel %vm35_vm0, %v48_v12, 0.0 }
  0xae   :  { %53 = vadd.xlane.f32.xlu1 %v52_v13 }
 0x137   :  { %v51_v14 = vpop.xlane.xlu1 %50 }
 0x138   :  { %v55_v15 = vmul.f32 0.032258064, %v51_v14 }
 0x13a   :  { %112 = vrsqrt.f32 %v55_v15  ;;  %vm59_vm1 = vcmp.eq.f32.partialorder %v55_v15, inf  ;;  %v62_v20 = vand.u32 2147483648, %v55_v15  ;;  %vm61_vm2 = vcmp.eq.f32.partialorder %v55_v15, 0.0 }
 0x13b   :  { %v54_v16 = vpop.xlane.xlu1 %53 }
 0x13c   :  { %v56_v17 = vmul.f32 0.032258064, %v54_v16 }
 0x13e   :  { %114 = vrsqrt.f32 %v56_v17  ;;  %vm66_vm3 = vcmp.eq.f32.partialorder %v56_v17, inf  ;;  %v69_v26 = vand.u32 2147483648, %v56_v17  ;;  %vm68_vm4 = vcmp.eq.f32.partialorder %v56_v17, 0.0 }
 0x144   :  { %v113_v18 = vpop.eup %112 }
 0x145   :  { %v58_v19 = vmul.f32 %v113_v18, %v55_v15 }
 0x147   :  { %v60_v21 = vsel %vm59_vm1, %v55_v15, %v58_v19 }
 0x148   :  { %v115_v22 = vpop.eup %114  ;;  %v63_v23 = vsel %vm61_vm2, %v62_v20, %v60_v21 }
 0x149   :  { %v65_v24 = vmul.f32 %v115_v22, %v56_v17  ;;  %v71_v25 = vadd.f32 1e-06, %v63_v23 }
 0x14b   :  { %v67_v27 = vsel %vm66_vm3, %v56_v17, %v65_v24  ;;  %116 = vrcp.f32 %v71_v25 }
 0x14c   :  { %v70_v28 = vsel %vm68_vm4, %v69_v26, %v67_v27 }
 0x14d   :  { %v72_v29 = vadd.f32 1e-06, %v70_v28 }
 0x14f   :  { %118 = vrcp.f32 %v72_v29 }
 0x155   :  { %v117_v30 = vpop.eup %116 }
 0x156   :  { %v75_v31 = vmul.f32 %v117_v30, %v71_v25 }
 0x158   :  { %v77_v33 = vsub.f32 2.0, %v75_v31 }
 0x159   :  { %v119_v34 = vpop.eup %118 }
 0x15a   :  { %v76_v36 = vmul.f32 %v119_v34, %v72_v29  ;;  %v79_v37 = vmul.f32 %v117_v30, %v77_v33 }
 0x15c   :  { %v78_v39 = vsub.f32 2.0, %v76_v36  ;;  %v84_v40 = vmul.f32 %v82_v35, %v79_v37 }
 0x15e   :  { %v80_v42 = vmul.f32 %v119_v34, %v78_v39  ;;  %v87_v43 = vadd.f32 %v86_v38, %v84_v40 }
 0x160   :  { %v85_v44 = vmul.f32 %v83_v41, %v80_v42  ;;  %89 = vst.msk [vmem:[#allocation7] sm:$0xff] %vm35_vm0, %v87_v43 }
 0x162   :  { %v88_v45 = vadd.f32 %v86_v38, %v85_v44 }
 0x164   :  { %90 = vst.msk [vmem:[#allocation7 + $0x8] sm:$0xff] %vm35_vm0, %v88_v45 }
 0x165   :  { %153 = shalt.err (!%p150_p12)
}
 0x166   :  { %s154_s5 = scalar_lea.hbm %s237_s3, 256 }
 0x167   :  { %p155_p13 = scmp.ne.s32.totalorder %s237_s3, %s154_s5  ;;  %p158_p0 = scmp.lt.u32.totalorder %s154_s5, %s237_s3 }
 0x169   :  { %p160_p1 = pnand %p158_p0, %p155_p13 }
 0x16b   :  { %163 = shalt.err (!%p160_p1)
}
 0x16c   :  { %102 = dma.vmem_to_hbm [thread:$0]  %s97_s30, 256, %s237_s3, [#allocation6], %s169_s22, %s169_s22, %s170_s23  }
 0x16d   :  { %166 = dma.done.wait [#allocation6], 256  }
 0x16e   :  { %167 = vsyncadd [#allocation6], 4294967040 }
 0x16f   :  { %106 = vsyncpa [#allocation5], 1 }
 0x170   :  { %107 = vsyncpa [#allocation6], 1 }

</bundles_post_ra>
